<compile_context>
chip_gen: v5e
topology: v5e:2x2
jax: 0.10.0
libtpu: 0.0.40
codegen_flags: <defaults>
</compile_context>

<pallas_src>
import functools
from math import erf, sqrt

import numpy as np

import jax
import jax.numpy as jnp
from jax.experimental import pallas as pl
from jax.experimental.pallas import tpu as pltpu

KERNLEN = 21
NSIG = 3
PAD = (KERNLEN - 1) // 2  # 10 -> "same" output size


def _norm_cdf(x):
    return 0.5 * (1.0 + np.vectorize(erf)(x / sqrt(2.0)))


def gauss_kernel_factors(kernlen=KERNLEN, nsig=NSIG):
    """Separable factor of the PyTorch module's 21x21 kernel.

    gauss_kernel() builds kernel[i, j] = sqrt(k1d[i]) * sqrt(k1d[j]) / Z, i.e. an
    exact rank-1 (separable) kernel. Returns (a, kernel2d) with
    kernel2d[i, j] == a[i] * a[j] (up to float roundoff).
    """
    interval = (2 * nsig + 1.0) / kernlen
    x = np.linspace(-nsig - interval / 2.0, nsig + interval / 2.0, kernlen + 1)
    kern1d = np.diff(_norm_cdf(x))
    kernel_raw = np.sqrt(np.outer(kern1d, kern1d))
    z = kernel_raw.sum()
    kernel2d = (kernel_raw / z).astype(np.float32)
    a = np.sqrt(kern1d) / np.sqrt(z)  # 1D separable factor (sums to 1)
    return a, kernel2d


def _band_matrix(n, a1d, pad):
    """B[j, o] = a1d[j - o + pad] when |j - o| <= pad else 0 (zero padding folded in)."""
    j = np.arange(n)[:, None]
    o = np.arange(n)[None, :]
    k = j - o + pad
    valid = (k >= 0) & (k < len(a1d))
    return np.where(valid, np.asarray(a1d)[np.clip(k, 0, len(a1d) - 1)], 0.0)


def _blur_kernel(x_ref, sw_ref, sht_ref, o_ref, *, planes, h):
    # x_ref:   (planes*h, W) bf16 stacked input planes (rows of Cb planes)
    # sw_ref:  (W, W)        bf16 banded horizontal weights  (tmp = x @ Sw)
    # sht_ref: (H, H)        bf16 banded vertical weights    (out = ShT @ tmp)
    # o_ref:   (planes*h, W) f32 output planes
    # Horizontal pass: one big matmul, M = planes*h fills the MXU M dimension.
    tmp = jnp.dot(x_ref[...], sw_ref[...], preferred_element_type=jnp.float32)
    tmp = tmp.astype(x_ref.dtype)
    sht = sht_ref[...]
    # Vertical pass: per-plane (H, H) @ (H, W), statically unrolled (static slices only).
    for p in range(planes):
        rows = slice(p * h, (p + 1) * h)
        out_p = jnp.dot(sht, tmp[rows, :], preferred_element_type=jnp.float32)
        o_ref[rows, :] = out_p.astype(o_ref.dtype)


def _pick_plane_block(P, H, W, target_rows=256, vmem_budget_elems=1 << 21):
    """Largest divisor Cb of P such that Cb*H reaches target_rows if possible,
    bounded by a rough per-block VMEM element budget."""
    cb = 1
    for d in range(1, P + 1):
        if P % d != 0:
            continue
        if d * H * W > vmem_budget_elems:
            break
        cb = d
        if d * H >= target_rows:
            break
    return cb


def blur(x, compute_dtype=jnp.bfloat16):
    """x: (N, C, H, W) float32. Depthwise 21x21 Gaussian blur, stride 1, padding 10
    (same semantics as Blur.forward, i.e. F.conv2d(..., padding=10, groups=C))."""
    N, C, H, W = x.shape
    P = N * C

    a, _ = gauss_kernel_factors()
    # Banded 1D weights with the zero padding folded in (no jnp.pad of the input).
    sw = jnp.asarray(_band_matrix(W, a, PAD), dtype=compute_dtype)      # (W, W)
    sht = jnp.asarray(_band_matrix(H, a, PAD).T, dtype=compute_dtype)   # (H, H)

    # Flatten all planes onto one row axis (free, contiguous reshape) and cast to bf16.
    xp = x.reshape(P * H, W).astype(compute_dtype)

    Cb = _pick_plane_block(P, H, W)
    grid = (P // Cb,)

    kernel = functools.partial(_blur_kernel, planes=Cb, h=H)

    out = pl.pallas_call(
        kernel,
        out_shape=jax.ShapeDtypeStruct((P * H, W), x.dtype),
        grid_spec=pltpu.PrefetchScalarGridSpec(
            num_scalar_prefetch=0,
            grid=grid,
            in_specs=[
                # Cb planes (Cb*H rows) per grid step.
                pl.BlockSpec((Cb * H, W), lambda g: (g, 0)),
                # Constant weights: index_map never changes -> fetched once.
                pl.BlockSpec((W, W), lambda g: (0, 0)),
                pl.BlockSpec((H, H), lambda g: (0, 0)),
            ],
            out_specs=pl.BlockSpec((Cb * H, W), lambda g: (g, 0)),
        ),
        compiler_params=pltpu.CompilerParams(
            dimension_semantics=("parallel",),
        ),
    )(xp, sw, sht)

    return out.reshape(N, C, H, W)


if __name__ == "__main__":
    key = jax.random.PRNGKey(0)
    N, C, H, W = 2, 4, 16, 16  # nc = 4
    x = jax.random.normal(key, (N, C, H, W), dtype=jnp.float32)

    out = jax.block_until_ready(blur(x))
    assert out.shape == (N, C, H, W)

    # Reference: depthwise conv exactly as in the PyTorch module
    # (weight (C, 1, 21, 21) = per-channel copies of the same Gaussian kernel).
    _, k2d = gauss_kernel_factors()
    w = jnp.asarray(np.repeat(k2d[None, None], C, axis=0))  # (C, 1, 21, 21)
    ref = jax.lax.conv_general_dilated(
        x, w,
        window_strides=(1, 1),
        padding=((PAD, PAD), (PAD, PAD)),
        dimension_numbers=("NCHW", "OIHW", "NCHW"),
        feature_group_count=C,
    )
    # bf16 inputs/weights with f32 accumulation -> relaxed tolerance vs f32 reference.
    np.testing.assert_allclose(np.asarray(out), np.asarray(ref), rtol=2e-2, atol=2e-2)

    print("KERNEL_OK")
</pallas_src>

<mosaic_0001>
module attributes {stable_mosaic.version = 11 : i64} {
  func.func @_blur_kernel(%arg0: i32, %arg1: memref<128x16xbf16, #tpu.memory_space<vmem>>, %arg2: memref<16x16xbf16, #tpu.memory_space<vmem>>, %arg3: memref<16x16xbf16, #tpu.memory_space<vmem>>, %arg4: memref<128x16xf32, #tpu.memory_space<vmem>>) attributes {dimension_semantics = [#tpu.dimension_semantics<parallel>], iteration_bounds = array<i64: 1>, scalar_prefetch = 0 : i64, scratch_operands = 0 : i64, tpu.core_type = #tpu.core_type<tc>, window_params = [{transform_indices = @transform_0, window_bounds = array<i64: 128, 16>}, {pipeline_mode = #tpu.pipeline_mode<synchronous>, transform_indices = @transform_1, window_bounds = array<i64: 16, 16>}, {pipeline_mode = #tpu.pipeline_mode<synchronous>, transform_indices = @transform_2, window_bounds = array<i64: 16, 16>}, {transform_indices = @transform_3, window_bounds = array<i64: 128, 16>}]} {
    %c0 = arith.constant 0 : index
    %c0_0 = arith.constant 0 : index
    %0 = vector.load %arg1[%c0, %c0_0] : memref<128x16xbf16, #tpu.memory_space<vmem>>, vector<128x16xbf16>
    %c0_1 = arith.constant 0 : index
    %c0_2 = arith.constant 0 : index
    %1 = vector.load %arg2[%c0_1, %c0_2] : memref<16x16xbf16, #tpu.memory_space<vmem>>, vector<16x16xbf16>
    %cst = arith.constant dense<0.000000e+00> : vector<128x16xf32>
    %2 = tpu.matmul %0, %1, %cst {dimension_numbers = #tpu.dot_dimension_numbers<[1], [0], [0], [1], [0, 0, 1, 1], [], []>} : vector<128x16xbf16>, vector<16x16xbf16>, vector<128x16xf32> -> vector<128x16xf32>
    %3 = arith.truncf %2 : vector<128x16xf32> to vector<128x16xbf16>
    %c0_3 = arith.constant 0 : index
    %c0_4 = arith.constant 0 : index
    %4 = vector.load %arg3[%c0_3, %c0_4] : memref<16x16xbf16, #tpu.memory_space<vmem>>, vector<16x16xbf16>
    %5 = vector.extract_strided_slice %3 {offsets = [0, 0], sizes = [16, 16], strides = [1, 1]} : vector<128x16xbf16> to vector<16x16xbf16>
    %cst_5 = arith.constant dense<0.000000e+00> : vector<16x16xf32>
    %6 = tpu.matmul %4, %5, %cst_5 {dimension_numbers = #tpu.dot_dimension_numbers<[1], [0], [0], [1], [0, 0, 1, 1], [], []>} : vector<16x16xbf16>, vector<16x16xbf16>, vector<16x16xf32> -> vector<16x16xf32>
    %c0_6 = arith.constant 0 : index
    %c0_7 = arith.constant 0 : index
    %7 = vector.load %arg4[%c0_6, %c0_7] : memref<128x16xf32, #tpu.memory_space<vmem>>, vector<16x16xf32>
    tpu.vector_store %arg4[%c0_6, %c0_7], %6 {strides = array<i32>} : memref<128x16xf32, #tpu.memory_space<vmem>>, vector<16x16xf32>,
    %8 = vector.extract_strided_slice %3 {offsets = [16, 0], sizes = [16, 16], strides = [1, 1]} : vector<128x16xbf16> to vector<16x16xbf16>
    %cst_8 = arith.constant dense<0.000000e+00> : vector<16x16xf32>
    %9 = tpu.matmul %4, %8, %cst_8 {dimension_numbers = #tpu.dot_dimension_numbers<[1], [0], [0], [1], [0, 0, 1, 1], [], []>} : vector<16x16xbf16>, vector<16x16xbf16>, vector<16x16xf32> -> vector<16x16xf32>
    %c16 = arith.constant 16 : index
    %c0_9 = arith.constant 0 : index
    %10 = vector.load %arg4[%c16, %c0_9] : memref<128x16xf32, #tpu.memory_space<vmem>>, vector<16x16xf32>
    tpu.vector_store %arg4[%c16, %c0_9], %9 {strides = array<i32>} : memref<128x16xf32, #tpu.memory_space<vmem>>, vector<16x16xf32>,
    %11 = vector.extract_strided_slice %3 {offsets = [32, 0], sizes = [16, 16], strides = [1, 1]} : vector<128x16xbf16> to vector<16x16xbf16>
    %cst_10 = arith.constant dense<0.000000e+00> : vector<16x16xf32>
    %12 = tpu.matmul %4, %11, %cst_10 {dimension_numbers = #tpu.dot_dimension_numbers<[1], [0], [0], [1], [0, 0, 1, 1], [], []>} : vector<16x16xbf16>, vector<16x16xbf16>, vector<16x16xf32> -> vector<16x16xf32>
    %c32 = arith.constant 32 : index
    %c0_11 = arith.constant 0 : index
    %13 = vector.load %arg4[%c32, %c0_11] : memref<128x16xf32, #tpu.memory_space<vmem>>, vector<16x16xf32>
    tpu.vector_store %arg4[%c32, %c0_11], %12 {strides = array<i32>} : memref<128x16xf32, #tpu.memory_space<vmem>>, vector<16x16xf32>,
    %14 = vector.extract_strided_slice %3 {offsets = [48, 0], sizes = [16, 16], strides = [1, 1]} : vector<128x16xbf16> to vector<16x16xbf16>
    %cst_12 = arith.constant dense<0.000000e+00> : vector<16x16xf32>
    %15 = tpu.matmul %4, %14, %cst_12 {dimension_numbers = #tpu.dot_dimension_numbers<[1], [0], [0], [1], [0, 0, 1, 1], [], []>} : vector<16x16xbf16>, vector<16x16xbf16>, vector<16x16xf32> -> vector<16x16xf32>
    %c48 = arith.constant 48 : index
    %c0_13 = arith.constant 0 : index
    %16 = vector.load %arg4[%c48, %c0_13] : memref<128x16xf32, #tpu.memory_space<vmem>>, vector<16x16xf32>
    tpu.vector_store %arg4[%c48, %c0_13], %15 {strides = array<i32>} : memref<128x16xf32, #tpu.memory_space<vmem>>, vector<16x16xf32>,
    %17 = vector.extract_strided_slice %3 {offsets = [64, 0], sizes = [16, 16], strides = [1, 1]} : vector<128x16xbf16> to vector<16x16xbf16>
    %cst_14 = arith.constant dense<0.000000e+00> : vector<16x16xf32>
    %18 = tpu.matmul %4, %17, %cst_14 {dimension_numbers = #tpu.dot_dimension_numbers<[1], [0], [0], [1], [0, 0, 1, 1], [], []>} : vector<16x16xbf16>, vector<16x16xbf16>, vector<16x16xf32> -> vector<16x16xf32>
    %c64 = arith.constant 64 : index
    %c0_15 = arith.constant 0 : index
    %19 = vector.load %arg4[%c64, %c0_15] : memref<128x16xf32, #tpu.memory_space<vmem>>, vector<16x16xf32>
    tpu.vector_store %arg4[%c64, %c0_15], %18 {strides = array<i32>} : memref<128x16xf32, #tpu.memory_space<vmem>>, vector<16x16xf32>,
    %20 = vector.extract_strided_slice %3 {offsets = [80, 0], sizes = [16, 16], strides = [1, 1]} : vector<128x16xbf16> to vector<16x16xbf16>
    %cst_16 = arith.constant dense<0.000000e+00> : vector<16x16xf32>
    %21 = tpu.matmul %4, %20, %cst_16 {dimension_numbers = #tpu.dot_dimension_numbers<[1], [0], [0], [1], [0, 0, 1, 1], [], []>} : vector<16x16xbf16>, vector<16x16xbf16>, vector<16x16xf32> -> vector<16x16xf32>
    %c80 = arith.constant 80 : index
    %c0_17 = arith.constant 0 : index
    %22 = vector.load %arg4[%c80, %c0_17] : memref<128x16xf32, #tpu.memory_space<vmem>>, vector<16x16xf32>
    tpu.vector_store %arg4[%c80, %c0_17], %21 {strides = array<i32>} : memref<128x16xf32, #tpu.memory_space<vmem>>, vector<16x16xf32>,
    %23 = vector.extract_strided_slice %3 {offsets = [96, 0], sizes = [16, 16], strides = [1, 1]} : vector<128x16xbf16> to vector<16x16xbf16>
    %cst_18 = arith.constant dense<0.000000e+00> : vector<16x16xf32>
    %24 = tpu.matmul %4, %23, %cst_18 {dimension_numbers = #tpu.dot_dimension_numbers<[1], [0], [0], [1], [0, 0, 1, 1], [], []>} : vector<16x16xbf16>, vector<16x16xbf16>, vector<16x16xf32> -> vector<16x16xf32>
    %c96 = arith.constant 96 : index
    %c0_19 = arith.constant 0 : index
    %25 = vector.load %arg4[%c96, %c0_19] : memref<128x16xf32, #tpu.memory_space<vmem>>, vector<16x16xf32>
    tpu.vector_store %arg4[%c96, %c0_19], %24 {strides = array<i32>} : memref<128x16xf32, #tpu.memory_space<vmem>>, vector<16x16xf32>,
    %26 = vector.extract_strided_slice %3 {offsets = [112, 0], sizes = [16, 16], strides = [1, 1]} : vector<128x16xbf16> to vector<16x16xbf16>
    %cst_20 = arith.constant dense<0.000000e+00> : vector<16x16xf32>
    %27 = tpu.matmul %4, %26, %cst_20 {dimension_numbers = #tpu.dot_dimension_numbers<[1], [0], [0], [1], [0, 0, 1, 1], [], []>} : vector<16x16xbf16>, vector<16x16xbf16>, vector<16x16xf32> -> vector<16x16xf32>
    %c112 = arith.constant 112 : index
    %c0_21 = arith.constant 0 : index
    %28 = vector.load %arg4[%c112, %c0_21] : memref<128x16xf32, #tpu.memory_space<vmem>>, vector<16x16xf32>
    tpu.vector_store %arg4[%c112, %c0_21], %27 {strides = array<i32>} : memref<128x16xf32, #tpu.memory_space<vmem>>, vector<16x16xf32>,
    return
  }
  func.func @transform_0(%arg0: i32) -> (i32, i32) {
    %c0_i32 = arith.constant 0 : i32
    %c0_i32_0 = arith.constant 0 : i32
    return %arg0, %c0_i32 : i32, i32
  }
  func.func @transform_1(%arg0: i32) -> (i32, i32) {
    %c0_i32 = arith.constant 0 : i32
    %c0_i32_0 = arith.constant 0 : i32
    %c0_i32_1 = arith.constant 0 : i32
    return %c0_i32, %c0_i32_0 : i32, i32
  }
  func.func @transform_2(%arg0: i32) -> (i32, i32) {
    %c0_i32 = arith.constant 0 : i32
    %c0_i32_0 = arith.constant 0 : i32
    %c0_i32_1 = arith.constant 0 : i32
    return %c0_i32, %c0_i32_0 : i32, i32
  }
  func.func @transform_3(%arg0: i32) -> (i32, i32) {
    %c0_i32 = arith.constant 0 : i32
    %c0_i32_0 = arith.constant 0 : i32
    return %arg0, %c0_i32 : i32, i32
  }
}

</mosaic_0001>

<bundles_post_ra>
// kernel: tpu_custom_call.1
= control target key start
LH: loop header
LB: loop body
LE: loop exit
PB: predicated region body
PF: predicated region fallthrough
CT: control target
= control target key end

     0   :  { %vm79_vm0 = vcmask 130048   ;;  %s558_s1 = inlined_call_operand.vmem [shape: bf16[16,16], index: 1, kind: input, shape index: {}]   ;;  %s559_s0 = inlined_call_operand.vmem [shape: bf16[128,16], index: 0, kind: input, shape index: {}]   ;;  %s560_s2 = inlined_call_operand.vmem [shape: bf16[16,16], index: 2, kind: input, shape index: {}]   ;;  %s561_s3 = inlined_call_operand.vmem [shape: f32[128,16], index: 3, kind: output, shape index: {}]  }
   0x1   :  { %v423_v0 = vld [vmem:[%s558_s1] sm:$0xff]  ;;  %v421_v2 = vld [vmem:[%s559_s0 + $0x30] sm:$0xff]  ;;  %v420_v4 = vld [vmem:[%s559_s0 + $0x28] sm:$0xff] }
   0x2   :  { %v415_v1 = vld [vmem:[%s559_s0] sm:$0xff]  ;;  %111 = vmatpush.bf16.msra.mxu0 %v423_v0  ;;  %427 = vmatpush.bf16.msra.mxu3 %v423_v0  ;;  %v416_v5 = vld [vmem:[%s559_s0 + $0x8] sm:$0xff]  ;;  %v422_v6 = vld [vmem:[%s559_s0 + $0x38] sm:$0xff] }
   0x3   :  { %425 = vmatpush.bf16.msra.mxu1 %v423_v0  ;;  %426 = vmatpush.bf16.msra.mxu2 %v423_v0  ;;  %v419_v3 = vld [vmem:[%s559_s0 + $0x20] sm:$0xff]  ;;  %v417_v7 = vld [vmem:[%s559_s0 + $0x10] sm:$0xff]  ;;  %v418_v8 = vld [vmem:[%s559_s0 + $0x18] sm:$0xff] }
   0x4   :  { %v424_v20 = vld [vmem:[%s560_s2] sm:$0xff] }
   0x5   :  { %395 = vmatmul.msk.bf16.vlgmr.msra.gmra.mxu0 %vm79_vm0, %v415_v1  ;;  %401 = vmatmul.msk.bf16.vlgmr.msra.gmra.mxu3 %vm79_vm0, %v421_v2 }
   0x6   :  { %399 = vmatmul.msk.bf16.vlgmr.msra.gmra.mxu1 %vm79_vm0, %v419_v3  ;;  %400 = vmatmul.msk.bf16.vlgmr.msra.gmra.mxu2 %vm79_vm0, %v420_v4 }
  0x15   :  { %396 = vmatmul.msk.bf16.gmra.mxu0 %vm79_vm0, %v416_v5  ;;  %402 = vmatmul.msk.bf16.gmra.mxu3 %vm79_vm0, %v422_v6 }
  0x25   :  { %397 = vmatmul.msk.bf16.gmra.mxu0 %vm79_vm0, %v417_v7 }
  0x35   :  { %398 = vmatmul.msk.bf16.gmra.mxu0 %vm79_vm0, %v418_v8 }
  0x82   :  { %v113_v9 = vpop.f32.mrf.mxu0 }
  0x83   :  { %v153_v11 = vpack.c.bf16 %v113_v9, %v113_v9  ;;  %v133_v12 = vpop.f32.mrf.mxu1 }
  0x84   :  { %v161_v22 = vpack.c.bf16 %v133_v12, %v133_v12 }
  0x85   :  { %v178_v15 = vunpack.c.l.b16 %v153_v11 }
  0x86   :  { %v269_v28 = vunpack.c.l.b16 %v161_v22 }
  0x88   :  { %v143_v10 = vpop.f32.mrf.mxu3 }
  0x89   :  { %v138_v26 = vpop.f32.mrf.mxu2  ;;  %v165_v55 = vpack.c.bf16 %v143_v10, %v143_v10 }
  0x8a   :  { %v115_v13 = vpop.f32.mrf.mxu0  ;;  %v163_v43 = vpack.c.bf16 %v138_v26, %v138_v26 }
  0x8b   :  { %v154_v14 = vpack.c.bf16 %v115_v13, %v115_v13  ;;  %v135_v21 = vpop.f32.mrf.mxu1  ;;  %v313_v60 = vunpack.c.l.b16 %v165_v55 }
  0x8c   :  { %v162_v23 = vpack.c.bf16 %v135_v21, %v135_v21  ;;  %v291_v47 = vunpack.c.l.b16 %v163_v43 }
  0x8d   :  { %v179_v16 = vunpack.c.l.b16 %v154_v14 }
  0x8e   :  { %v270_v29 = vunpack.c.l.b16 %v162_v23 }
  0x8f   :  { %v180_v17 = vpack.c.b16 %v179_v16, %v178_v15 }
  0x90   :  { %v145_v18 = vpop.f32.mrf.mxu3  ;;  %v271_v34 = vpack.c.b16 %v270_v29, %v269_v28 }
  0x91   :  { %192 = vmatpush.bf16.msrb.mxu1 %v180_v17  ;;  %v140_v40 = vpop.f32.mrf.mxu2  ;;  %v166_v56 = vpack.c.bf16 %v145_v18, %v145_v18 }
  0x92   :  { %v118_v19 = vpop.f32.mrf.mxu0  ;;  %v164_v44 = vpack.c.bf16 %v140_v40, %v140_v40 }
  0x93   :  { %v155_v25 = vpack.c.bf16 %v118_v19, %v118_v19  ;;  %v314_v61 = vunpack.c.l.b16 %v166_v56 }
  0x94   :  { %407 = vmatmul.msk.bf16.vlgmr.msrb.gmra.mxu1 %vm79_vm0, %v424_v20  ;;  %v292_v48 = vunpack.c.l.b16 %v164_v44 }
  0x95   :  { %v203_v31 = vunpack.c.l.b16 %v155_v25  ;;  %v315_v1 = vpack.c.b16 %v314_v61, %v313_v60 }
  0x96   :  { %v293_v52 = vpack.c.b16 %v292_v48, %v291_v47 }
  0x98   :  { %v148_v24 = vpop.f32.mrf.mxu3 }
  0x99   :  { %v167_v33 = vpack.c.bf16 %v148_v24, %v148_v24 }
  0x9a   :  { %v120_v27 = vpop.f32.mrf.mxu0 }
  0x9b   :  { %v156_v30 = vpack.c.bf16 %v120_v27, %v120_v27  ;;  %v335_v37 = vunpack.c.l.b16 %v167_v33 }
  0x9d   :  { %v204_v32 = vunpack.c.l.b16 %v156_v30 }
  0x9f   :  { %v205_v35 = vpack.c.b16 %v204_v32, %v203_v31 }
  0xa0   :  { %v150_v36 = vpop.f32.mrf.mxu3 }
  0xa1   :  { %214 = vmatpush.bf16.msrb.mxu2 %v205_v35  ;;  %v168_v38 = vpack.c.bf16 %v150_v36, %v150_v36 }
  0xa2   :  { %v123_v39 = vpop.f32.mrf.mxu0 }
  0xa3   :  { %v336_v41 = vunpack.c.l.b16 %v168_v38  ;;  %v157_v45 = vpack.c.bf16 %v123_v39, %v123_v39 }
  0xa4   :  { %408 = vmatmul.msk.bf16.vlgmr.msrb.gmra.mxu2 %vm79_vm0, %v424_v20 }
  0xa5   :  { %280 = vmatpush.bf16.msra.mxu2 %v271_v34  ;;  %v337_v42 = vpack.c.b16 %v336_v41, %v335_v37  ;;  %v225_v50 = vunpack.c.l.b16 %v157_v45 }
  0xa9   :  { %346 = vmatpush.bf16.msrb.mxu2 %v337_v42 }
  0xaa   :  { %v125_v46 = vpop.f32.mrf.mxu0 }
  0xab   :  { %v158_v49 = vpack.c.bf16 %v125_v46, %v125_v46 }
  0xad   :  { %v226_v51 = vunpack.c.l.b16 %v158_v49 }
  0xaf   :  { %v227_v53 = vpack.c.b16 %v226_v51, %v225_v50 }
  0xb1   :  { %236 = vmatpush.bf16.msrb.mxu3 %v227_v53 }
  0xb2   :  { %v128_v54 = vpop.f32.mrf.mxu0 }
  0xb3   :  { %v159_v57 = vpack.c.bf16 %v128_v54, %v128_v54 }
  0xb4   :  { %409 = vmatmul.msk.bf16.vlgmr.msrb.gmra.mxu3 %vm79_vm0, %v424_v20  ;;  %411 = vmatmul.msk.bf16.vlgmr.msra.gmra.mxu2 %vm79_vm0, %v424_v20 }
  0xb5   :  { %302 = vmatpush.bf16.msra.mxu3 %v293_v52  ;;  %v247_v62 = vunpack.c.l.b16 %v159_v57 }
  0xba   :  { %v130_v58 = vpop.f32.mrf.mxu0 }
  0xbb   :  { %v160_v59 = vpack.c.bf16 %v130_v58, %v130_v58 }
  0xbd   :  { %v248_v63 = vunpack.c.l.b16 %v160_v59 }
  0xbf   :  { %v249_v0 = vpack.c.b16 %v248_v63, %v247_v62 }
  0xc1   :  { %258 = vmatpush.bf16.msra.mxu1 %v249_v0 }
  0xc4   :  { %410 = vmatmul.msk.bf16.vlgmr.msra.gmra.mxu1 %vm79_vm0, %v424_v20  ;;  %412 = vmatmul.msk.bf16.vlgmr.msra.gmra.mxu3 %vm79_vm0, %v424_v20 }
  0xc5   :  { %324 = vmatpush.bf16.msrb.mxu1 %v315_v1  ;;  %414 = vmatmul.msk.bf16.vlgmr.msrb.gmra.mxu2 %vm79_vm0, %v424_v20 }
  0xd4   :  { %413 = vmatmul.msk.bf16.vlgmr.msrb.gmra.mxu1 %vm79_vm0, %v424_v20 }
 0x111   :  { %v194_v2 = vpop.f32.mrf.mxu1 }
 0x112   :  { %199 = vst.msk [vmem:[%s561_s3] sm:$0xff] %vm79_vm0, %v194_v2 }
 0x119   :  { %v196_v3 = vpop.f32.mrf.mxu1 }
 0x11a   :  { %200 = vst.msk [vmem:[%s561_s3 + $0x8] sm:$0xff] %vm79_vm0, %v196_v3 }
 0x127   :  { %v216_v4 = vpop.f32.mrf.mxu2 }
 0x128   :  { %221 = vst.msk [vmem:[%s561_s3 + $0x10] sm:$0xff] %vm79_vm0, %v216_v4 }
 0x12f   :  { %v218_v5 = vpop.f32.mrf.mxu2 }
 0x130   :  { %222 = vst.msk [vmem:[%s561_s3 + $0x18] sm:$0xff] %vm79_vm0, %v218_v5 }
 0x137   :  { %v238_v6 = vpop.f32.mrf.mxu3  ;;  %v282_v7 = vpop.f32.mrf.mxu2 }
 0x138   :  { %243 = vst.msk [vmem:[%s561_s3 + $0x20] sm:$0xff] %vm79_vm0, %v238_v6 }
 0x139   :  { %287 = vst.msk [vmem:[%s561_s3 + $0x40] sm:$0xff] %vm79_vm0, %v282_v7 }
 0x13f   :  { %v240_v8 = vpop.f32.mrf.mxu3  ;;  %v284_v9 = vpop.f32.mrf.mxu2 }
 0x140   :  { %244 = vst.msk [vmem:[%s561_s3 + $0x28] sm:$0xff] %vm79_vm0, %v240_v8 }
 0x141   :  { %v260_v10 = vpop.f32.mrf.mxu1  ;;  %288 = vst.msk [vmem:[%s561_s3 + $0x48] sm:$0xff] %vm79_vm0, %v284_v9 }
 0x142   :  { %265 = vst.msk [vmem:[%s561_s3 + $0x30] sm:$0xff] %vm79_vm0, %v260_v10 }
 0x147   :  { %v304_v11 = vpop.f32.mrf.mxu3 }
 0x148   :  { %309 = vst.msk [vmem:[%s561_s3 + $0x50] sm:$0xff] %vm79_vm0, %v304_v11  ;;  %v348_v12 = vpop.f32.mrf.mxu2 }
 0x149   :  { %v262_v13 = vpop.f32.mrf.mxu1  ;;  %353 = vst.msk [vmem:[%s561_s3 + $0x70] sm:$0xff] %vm79_vm0, %v348_v12 }
 0x14a   :  { %266 = vst.msk [vmem:[%s561_s3 + $0x38] sm:$0xff] %vm79_vm0, %v262_v13 }
 0x14f   :  { %v306_v14 = vpop.f32.mrf.mxu3 }
 0x150   :  { %310 = vst.msk [vmem:[%s561_s3 + $0x58] sm:$0xff] %vm79_vm0, %v306_v14  ;;  %v350_v15 = vpop.f32.mrf.mxu2 }
 0x151   :  { %v326_v16 = vpop.f32.mrf.mxu1  ;;  %354 = vst.msk [vmem:[%s561_s3 + $0x78] sm:$0xff] %vm79_vm0, %v350_v15 }
 0x152   :  { %331 = vst.msk [vmem:[%s561_s3 + $0x60] sm:$0xff] %vm79_vm0, %v326_v16 }
 0x159   :  { %v328_v17 = vpop.f32.mrf.mxu1 }
 0x15a   :  { %332 = vst.msk [vmem:[%s561_s3 + $0x68] sm:$0xff] %vm79_vm0, %v328_v17 }

</bundles_post_ra>
